<compile_context>
chip_gen: v7x
topology: tpu7x:2x2x1
jax: 0.10.0
libtpu: 0.0.40
codegen_flags: <defaults>
</compile_context>

<pallas_src>
import jax
import jax.numpy as jnp
from jax.experimental import pallas as pl
from jax.experimental.pallas import tpu as pltpu

LANE = 128
SUBLANE = 8


def _round_up(n, m):
    return ((n + m - 1) // m) * m


def policy_kernel(x_ref, w1_ref, b1_ref, w2_ref, b2_ref, w3_ref, b3_ref, o_ref):
    """Fused MLP forward on one batch tile:
    relu(x@W1+b1) -> relu(.@W2+b2) -> softmax(.@W3+b3)."""
    x = x_ref[...]  # (TB, Kp) bf16

    # MXU matmuls in bf16 with f32 accumulation; elementwise stays f32.
    h1 = jnp.dot(x, w1_ref[...], preferred_element_type=jnp.float32) + b1_ref[...]
    h1 = jnp.maximum(h1, 0.0)

    h2 = jnp.dot(h1.astype(jnp.bfloat16), w2_ref[...],
                 preferred_element_type=jnp.float32) + b2_ref[...]
    h2 = jnp.maximum(h2, 0.0)

    logits = jnp.dot(h2.astype(jnp.bfloat16), w3_ref[...],
                     preferred_element_type=jnp.float32) + b3_ref[...]

    # Numerically-stable softmax over the (lane-dense, padded) action axis.
    # Padded columns carry a -1e30 bias -> exp() == 0 -> no contribution.
    m = jnp.max(logits, axis=-1, keepdims=True)
    e = jnp.exp(logits - m)
    s = jnp.sum(e, axis=-1, keepdims=True)
    o_ref[...] = e * pl.reciprocal(s, approx=True)


def prepare_params(w1, b1, w2, b2, w3, b3):
    """Pad params to lane-dense shapes and cast matmul operands to bf16.

    Inputs are 'logical' (in, out)-layout params:
      w1 (state_dim, 128), w2 (128, 64), w3 (64, action_dim), biases (1, out).
    """
    state_dim = w1.shape[0]
    action_dim = w3.shape[1]
    kp = _round_up(state_dim, LANE)      # padded K of first matmul
    npad = _round_up(action_dim, LANE)   # padded N of last matmul (lane-dense out)

    w1p = jnp.zeros((kp, 128), jnp.float32).at[:state_dim, :].set(w1)
    w3p = jnp.zeros((64, npad), jnp.float32).at[:, :action_dim].set(w3)
    # Large negative bias on padded logit columns so softmax ignores them.
    b3p = jnp.full((1, npad), -1e30, jnp.float32).at[:, :action_dim].set(b3)

    params = (w1p.astype(jnp.bfloat16), b1.astype(jnp.float32),
              w2.astype(jnp.bfloat16), b2.astype(jnp.float32),
              w3p.astype(jnp.bfloat16), b3p)
    return params, state_dim, action_dim


def policy_forward(x, prepared, *, tb=512):
    """x: (B, state_dim) float32 -> (B, action_dim) action probabilities."""
    (w1, b1, w2, b2, w3, b3), state_dim, action_dim = prepared
    B = x.shape[0]
    kp = w1.shape[0]
    npad = w3.shape[1]

    # Batch tile: big enough to amortize per-step overhead, clamped for small B.
    tb = min(tb, _round_up(B, SUBLANE))
    b_pad = _round_up(B, tb)

    # Pad batch rows (zeros -> harmless softmax rows) and K columns, cast to bf16.
    xp = jnp.zeros((b_pad, kp), jnp.bfloat16).at[:B, :state_dim].set(
        x.astype(jnp.bfloat16))

    out = pl.pallas_call(
        policy_kernel,
        out_shape=jax.ShapeDtypeStruct((b_pad, npad), jnp.float32),
        grid=(b_pad // tb,),
        in_specs=[
            pl.BlockSpec((tb, kp), lambda i: (i, 0)),    # x tile streams per step
            pl.BlockSpec((kp, 128), lambda i: (0, 0)),   # weights stay resident
            pl.BlockSpec((1, 128), lambda i: (0, 0)),
            pl.BlockSpec((128, 64), lambda i: (0, 0)),
            pl.BlockSpec((1, 64), lambda i: (0, 0)),
            pl.BlockSpec((64, npad), lambda i: (0, 0)),
            pl.BlockSpec((1, npad), lambda i: (0, 0)),
        ],
        out_specs=pl.BlockSpec((tb, npad), lambda i: (i, 0)),
        compiler_params=pltpu.CompilerParams(
            dimension_semantics=("parallel",)),
    )(xp, w1, b1, w2, b2, w3, b3)

    return out[:B, :action_dim]


def orthogonal_init(key, rows, cols):
    """Deterministic orthogonal init (rows x cols), matching nn.init.orthogonal_."""
    n = max(rows, cols)
    a = jax.random.normal(key, (n, n), dtype=jnp.float32)
    q, r = jnp.linalg.qr(a)
    q = q * jnp.sign(jnp.diagonal(r))
    return q[:rows, :cols]


def make_params(key, state_dim, action_dim):
    k1, k2, k3, kb1, kb2, kb3 = jax.random.split(key, 6)
    # PyTorch nn.Linear weight is (out, in); store transposed (in, out).
    w1 = orthogonal_init(k1, 128, state_dim).T           # (state_dim, 128)
    w2 = orthogonal_init(k2, 64, 128).T                  # (128, 64)
    w3 = orthogonal_init(k3, action_dim, 64).T           # (64, action_dim)
    b1 = jax.random.uniform(kb1, (1, 128), jnp.float32,
                            -1.0 / jnp.sqrt(state_dim), 1.0 / jnp.sqrt(state_dim))
    b2 = jax.random.uniform(kb2, (1, 64), jnp.float32,
                            -1.0 / jnp.sqrt(128.0), 1.0 / jnp.sqrt(128.0))
    b3 = jax.random.uniform(kb3, (1, action_dim), jnp.float32,
                            -1.0 / jnp.sqrt(64.0), 1.0 / jnp.sqrt(64.0))
    return (w1.astype(jnp.float32), b1, w2.astype(jnp.float32), b2,
            w3.astype(jnp.float32), b3)


def reference_forward(x, params):
    """Pure-JAX f32 reference for correctness checking."""
    w1, b1, w2, b2, w3, b3 = params
    h1 = jnp.maximum(x @ w1 + b1, 0.0)
    h2 = jnp.maximum(h1 @ w2 + b2, 0.0)
    return jax.nn.softmax(h2 @ w3 + b3, axis=-1)


if __name__ == "__main__":
    state_dim = 32
    action_dim = 8
    batch = 8

    key = jax.random.PRNGKey(0)
    k_params, k_x = jax.random.split(key)
    raw_params = make_params(k_params, state_dim, action_dim)
    prepared = prepare_params(*raw_params)
    x = jax.random.normal(k_x, (batch, state_dim), dtype=jnp.float32)

    probs = policy_forward(x, prepared)
    probs = jax.block_until_ready(probs)

    # sanity: shape, finite, softmax rows sum to ~1, close to f32 reference
    assert probs.shape == (batch, action_dim)
    assert bool(jnp.all(jnp.isfinite(probs)))
    assert jnp.allclose(jnp.sum(probs, axis=-1), 1.0, atol=1e-2)
    ref = reference_forward(x, raw_params)
    assert jnp.allclose(probs, ref, atol=5e-2)

    print("KERNEL_OK")
</pallas_src>

<mosaic_0001>
module attributes {stable_mosaic.version = 11 : i64} {
  func.func @policy_kernel(%arg0: i32, %arg1: memref<8x128xbf16, #tpu.memory_space<vmem>>, %arg2: memref<128x128xbf16, #tpu.memory_space<vmem>>, %arg3: memref<1x128xf32, #tpu.memory_space<vmem>>, %arg4: memref<128x64xbf16, #tpu.memory_space<vmem>>, %arg5: memref<1x64xf32, #tpu.memory_space<vmem>>, %arg6: memref<64x128xbf16, #tpu.memory_space<vmem>>, %arg7: memref<1x128xf32, #tpu.memory_space<vmem>>, %arg8: memref<8x128xf32, #tpu.memory_space<vmem>>) attributes {dimension_semantics = [#tpu.dimension_semantics<parallel>], iteration_bounds = array<i64: 1>, scalar_prefetch = 0 : i64, scratch_operands = 0 : i64, tpu.core_type = #tpu.core_type<tc>, window_params = [{transform_indices = @transform_0, window_bounds = array<i64: 8, 128>}, {pipeline_mode = #tpu.pipeline_mode<synchronous>, transform_indices = @transform_1, window_bounds = array<i64: 128, 128>}, {pipeline_mode = #tpu.pipeline_mode<synchronous>, transform_indices = @transform_2, window_bounds = array<i64: 1, 128>}, {pipeline_mode = #tpu.pipeline_mode<synchronous>, transform_indices = @transform_3, window_bounds = array<i64: 128, 64>}, {pipeline_mode = #tpu.pipeline_mode<synchronous>, transform_indices = @transform_4, window_bounds = array<i64: 1, 64>}, {pipeline_mode = #tpu.pipeline_mode<synchronous>, transform_indices = @transform_5, window_bounds = array<i64: 64, 128>}, {pipeline_mode = #tpu.pipeline_mode<synchronous>, transform_indices = @transform_6, window_bounds = array<i64: 1, 128>}, {transform_indices = @transform_7, window_bounds = array<i64: 8, 128>}]} {
    %c0 = arith.constant 0 : index
    %c0_0 = arith.constant 0 : index
    %0 = vector.load %arg1[%c0, %c0_0] : memref<8x128xbf16, #tpu.memory_space<vmem>>, vector<8x128xbf16>
    %c0_1 = arith.constant 0 : index
    %c0_2 = arith.constant 0 : index
    %1 = vector.load %arg2[%c0_1, %c0_2] : memref<128x128xbf16, #tpu.memory_space<vmem>>, vector<128x128xbf16>
    %cst = arith.constant dense<0.000000e+00> : vector<8x128xf32>
    %2 = tpu.matmul %0, %1, %cst {dimension_numbers = #tpu.dot_dimension_numbers<[1], [0], [0], [1], [0, 0, 1, 1], [], []>} : vector<8x128xbf16>, vector<128x128xbf16>, vector<8x128xf32> -> vector<8x128xf32>
    %c0_3 = arith.constant 0 : index
    %c0_4 = arith.constant 0 : index
    %3 = vector.load %arg3[%c0_3, %c0_4] : memref<1x128xf32, #tpu.memory_space<vmem>>, vector<1x128xf32>
    %4 = vector.broadcast %3 : vector<1x128xf32> to vector<8x128xf32>
    %5 = arith.addf %2, %4 : vector<8x128xf32>
    %cst_5 = arith.constant 0.000000e+00 : f32
    %6 = vector.broadcast %cst_5 : f32 to vector<8x128xf32>
    %7 = arith.maximumf %5, %6 : vector<8x128xf32>
    %8 = arith.truncf %7 : vector<8x128xf32> to vector<8x128xbf16>
    %c0_6 = arith.constant 0 : index
    %c0_7 = arith.constant 0 : index
    %9 = vector.load %arg4[%c0_6, %c0_7] : memref<128x64xbf16, #tpu.memory_space<vmem>>, vector<128x64xbf16>
    %cst_8 = arith.constant dense<0.000000e+00> : vector<8x64xf32>
    %10 = tpu.matmul %8, %9, %cst_8 {dimension_numbers = #tpu.dot_dimension_numbers<[1], [0], [0], [1], [0, 0, 1, 1], [], []>} : vector<8x128xbf16>, vector<128x64xbf16>, vector<8x64xf32> -> vector<8x64xf32>
    %c0_9 = arith.constant 0 : index
    %c0_10 = arith.constant 0 : index
    %11 = vector.load %arg5[%c0_9, %c0_10] : memref<1x64xf32, #tpu.memory_space<vmem>>, vector<1x64xf32>
    %12 = vector.broadcast %11 : vector<1x64xf32> to vector<8x64xf32>
    %13 = arith.addf %10, %12 : vector<8x64xf32>
    %cst_11 = arith.constant 0.000000e+00 : f32
    %14 = vector.broadcast %cst_11 : f32 to vector<8x64xf32>
    %15 = arith.maximumf %13, %14 : vector<8x64xf32>
    %16 = arith.truncf %15 : vector<8x64xf32> to vector<8x64xbf16>
    %c0_12 = arith.constant 0 : index
    %c0_13 = arith.constant 0 : index
    %17 = vector.load %arg6[%c0_12, %c0_13] : memref<64x128xbf16, #tpu.memory_space<vmem>>, vector<64x128xbf16>
    %cst_14 = arith.constant dense<0.000000e+00> : vector<8x128xf32>
    %18 = tpu.matmul %16, %17, %cst_14 {dimension_numbers = #tpu.dot_dimension_numbers<[1], [0], [0], [1], [0, 0, 1, 1], [], []>} : vector<8x64xbf16>, vector<64x128xbf16>, vector<8x128xf32> -> vector<8x128xf32>
    %c0_15 = arith.constant 0 : index
    %c0_16 = arith.constant 0 : index
    %19 = vector.load %arg7[%c0_15, %c0_16] : memref<1x128xf32, #tpu.memory_space<vmem>>, vector<1x128xf32>
    %20 = vector.broadcast %19 : vector<1x128xf32> to vector<8x128xf32>
    %21 = arith.addf %18, %20 : vector<8x128xf32>
    %cst_17 = arith.constant dense<0xFF800000> : vector<8xf32>
    %22 = vector.multi_reduction <maximumf>, %21, %cst_17 [1] : vector<8x128xf32> to vector<8xf32>
    %23 = vector.shape_cast %22 : vector<8xf32> to vector<8x1xf32>
    %24 = vector.broadcast %23 : vector<8x1xf32> to vector<8x128xf32>
    %25 = arith.subf %21, %24 : vector<8x128xf32>
    %26 = math.exp %25 : vector<8x128xf32>
    %cst_18 = arith.constant dense<0.000000e+00> : vector<8xf32>
    %27 = vector.multi_reduction <add>, %26, %cst_18 [1] : vector<8x128xf32> to vector<8xf32>
    %28 = vector.shape_cast %27 : vector<8xf32> to vector<8x1xf32>
    %29 = tpu.reciprocal %28 {approx = true} : vector<8x1xf32> -> vector<8x1xf32>
    %30 = vector.broadcast %29 : vector<8x1xf32> to vector<8x128xf32>
    %31 = arith.mulf %26, %30 : vector<8x128xf32>
    %c0_19 = arith.constant 0 : index
    %c0_20 = arith.constant 0 : index
    %32 = vector.load %arg8[%c0_19, %c0_20] : memref<8x128xf32, #tpu.memory_space<vmem>>, vector<8x128xf32>
    tpu.vector_store %arg8[%c0_19, %c0_20], %31 {strides = array<i32>} : memref<8x128xf32, #tpu.memory_space<vmem>>, vector<8x128xf32>,
    return
  }
  func.func @transform_0(%arg0: i32) -> (i32, i32) {
    %c0_i32 = arith.constant 0 : i32
    %c0_i32_0 = arith.constant 0 : i32
    return %arg0, %c0_i32 : i32, i32
  }
  func.func @transform_1(%arg0: i32) -> (i32, i32) {
    %c0_i32 = arith.constant 0 : i32
    %c0_i32_0 = arith.constant 0 : i32
    %c0_i32_1 = arith.constant 0 : i32
    return %c0_i32, %c0_i32_0 : i32, i32
  }
  func.func @transform_2(%arg0: i32) -> (i32, i32) {
    %c0_i32 = arith.constant 0 : i32
    %c0_i32_0 = arith.constant 0 : i32
    %c0_i32_1 = arith.constant 0 : i32
    return %c0_i32, %c0_i32_0 : i32, i32
  }
  func.func @transform_3(%arg0: i32) -> (i32, i32) {
    %c0_i32 = arith.constant 0 : i32
    %c0_i32_0 = arith.constant 0 : i32
    %c0_i32_1 = arith.constant 0 : i32
    return %c0_i32, %c0_i32_0 : i32, i32
  }
  func.func @transform_4(%arg0: i32) -> (i32, i32) {
    %c0_i32 = arith.constant 0 : i32
    %c0_i32_0 = arith.constant 0 : i32
    %c0_i32_1 = arith.constant 0 : i32
    return %c0_i32, %c0_i32_0 : i32, i32
  }
  func.func @transform_5(%arg0: i32) -> (i32, i32) {
    %c0_i32 = arith.constant 0 : i32
    %c0_i32_0 = arith.constant 0 : i32
    %c0_i32_1 = arith.constant 0 : i32
    return %c0_i32, %c0_i32_0 : i32, i32
  }
  func.func @transform_6(%arg0: i32) -> (i32, i32) {
    %c0_i32 = arith.constant 0 : i32
    %c0_i32_0 = arith.constant 0 : i32
    %c0_i32_1 = arith.constant 0 : i32
    return %c0_i32, %c0_i32_0 : i32, i32
  }
  func.func @transform_7(%arg0: i32) -> (i32, i32) {
    %c0_i32 = arith.constant 0 : i32
    %c0_i32_0 = arith.constant 0 : i32
    return %arg0, %c0_i32 : i32, i32
  }
}

</mosaic_0001>

<bundles_post_ra>
// kernel: tpu_custom_call.1
= control target key start
LH: loop header
LB: loop body
LE: loop exit
PB: predicated region body
PF: predicated region fallthrough
CT: control target
= control target key end

     0   :  { %12 = vsyncpa [#allocation3], 0  ;;  %s713_s0 = inlined_call_operand.hbm [shape: bf16[8,128], index: 0, kind: input, shape index: {}]   ;;  %s714_s1 = inlined_call_operand.vmem [shape: bf16[128,128], index: 1, kind: input, shape index: {}]   ;;  %s715_s2 = inlined_call_operand.vmem [shape: f32[1,128], index: 2, kind: input, shape index: {}]   ;;  %s716_s3 = inlined_call_operand.vmem [shape: bf16[128,64], index: 3, kind: input, shape index: {}]   ;;  %s717_s4 = inlined_call_operand.vmem [shape: f32[1,64], index: 4, kind: input, shape index: {}]   ;;  %s718_s5 = inlined_call_operand.vmem [shape: bf16[64,128], index: 5, kind: input, shape index: {}]   ;;  %s719_s6 = inlined_call_operand.vmem [shape: f32[1,128], index: 6, kind: input, shape index: {}]   ;;  %s720_s7 = inlined_call_operand.hbm [shape: f32[8,128], index: 7, kind: output, shape index: {}]  }
   0x1   :  { %13 = vsyncpa [#allocation4], 0  ;;  %s550_s24 = smov [#allocation2]   ;;  %s502_s28 = scalar_lea.hbm %s713_s0, 64 }
   0x2   :  { %s20_s25 = sshll.u32 %s550_s24, 4  ;;  %p503_p0 = scmp.ne.s32.totalorder %s713_s0, %s502_s28  ;;  %s21_s25 = int_to_ptr.vmem [resolvable:$true] %s20_s25 }
   0x3   :  { %p506_p1 = scmp.lt.u32.totalorder %s502_s28, %s713_s0 }
   0x5   :  { %p508_p2 = pnand %p506_p1, %p503_p0 }
   0x7   :  { %511 = shalt.err (!%p508_p2)
}
   0x8   :  { %s512_s10 = scalar_lea.vmem %s21_s25, 64  ;;  %p517_p4 = scmp.lt.s32.totalorder %s21_s25, %s21_s25 }
   0x9   :  { %p513_p3 = scmp.ne.s32.totalorder %s21_s25, %s512_s10  ;;  %p518_p5 = scmp.lt.s32.totalorder %s512_s10, %s512_s10 }
   0xb   :  { %p519_p6 = por %p518_p5, %p517_p4 }
   0xd   :  { %p520_p7 = pnand %p519_p6, %p513_p3 }
   0xf   :  { %523 = shalt.err (!%p520_p7)
}
  0x10   :  { %23 = dma.hbm_to_vmem [thread:$0]  %s713_s0, 64, %s21_s25, [#allocation3]  }
  0x11   :  { %546 = dma.done.wait [#allocation3], 64  }
  0x12   :  { %547 = vsyncadd [#allocation3], 4294967232  ;;  %v551_v0 = vmov 0.0   ;;  %vm552_vm0 = vmmov 0   ;;  %v478_v1 = vld [vmem:[%s714_s1] sm:$0xff]   ;;  %v479_v2 = vld [vmem:[%s714_s1 + $0x8] sm:$0xff]  }
  0x13   :  { %422 = vmatprep.subr.bf16.mxu0 %v551_v0  ;;  %438 = vmatprep.mubr.msk.bf16.mxu0 %vm552_vm0, %v551_v0  ;;  %v480_v3 = vld [vmem:[%s714_s1 + $0x10] sm:$0xff]   ;;  %v486_v4 = vld [vmem:[%s716_s3] sm:$0xff]   ;;  %v481_v5 = vld [vmem:[%s714_s1 + $0x18] sm:$0xff]   ;;  %vm306_vm1 = vcmask 523264  }
  0x14   :  { %442 = vmatprep.subr.bf16.mxu1 %v551_v0  ;;  %458 = vmatprep.mubr.msk.bf16.mxu1 %vm552_vm0, %v551_v0  ;;  %v487_v6 = vld [vmem:[%s716_s3 + $0x8] sm:$0xff]   ;;  %v482_v7 = vld [vmem:[%s714_s1 + $0x20] sm:$0xff]   ;;  %v488_v8 = vld [vmem:[%s716_s3 + $0x10] sm:$0xff]  }
  0x15   :  { %423 = vmatpush3.bf16.msra.mxu0 %v478_v1  ;;  %443 = vmatpush3.bf16.msra.mxu1 %v486_v4  ;;  %v483_v9 = vld [vmem:[%s714_s1 + $0x28] sm:$0xff]   ;;  %v489_v10 = vld [vmem:[%s716_s3 + $0x18] sm:$0xff]   ;;  %v484_v11 = vld [vmem:[%s714_s1 + $0x30] sm:$0xff]  }
  0x16   :  { %424 = vmatprep.subr.bf16.mxu0 %v551_v0  ;;  %444 = vmatprep.subr.bf16.mxu1 %v551_v0  ;;  %v490_v12 = vld [vmem:[%s716_s3 + $0x20] sm:$0xff]   ;;  %v485_v13 = vld [vmem:[%s714_s1 + $0x38] sm:$0xff]   ;;  %v491_v14 = vld [vmem:[%s716_s3 + $0x28] sm:$0xff]  }
  0x17   :  { %v40_v15 = vld [vmem:[#allocation2] sm:$0xf]  ;;  %v492_v16 = vld [vmem:[%s716_s3 + $0x30] sm:$0xff]   ;;  %v493_v17 = vld [vmem:[%s716_s3 + $0x38] sm:$0xff]  }
  0x18   :  { %v494_v18 = vld [vmem:[%s718_s5] sm:$0xff]   ;;  %v495_v19 = vld [vmem:[%s718_s5 + $0x8] sm:$0xff]   ;;  %v496_v28 = vld [vmem:[%s718_s5 + $0x10] sm:$0xff]  }
  0x19   :  { %425 = vmatpush3.bf16.msra.mxu0 %v479_v2  ;;  %445 = vmatpush3.bf16.msra.mxu1 %v487_v6  ;;  %v375_v20 = vld [vmem:[%s715_s2] ss:$0 sm:$0xff]  ;;  %v497_v29 = vld [vmem:[%s718_s5 + $0x18] sm:$0xff]  }
  0x1a   :  { %426 = vmatprep.subr.bf16.mxu0 %v551_v0  ;;  %446 = vmatprep.subr.bf16.mxu1 %v551_v0  ;;  %v384_v30 = vld [vmem:[%s717_s4] ss:$0 sm:$0xff]  ;;  %s553_s4 = smov [#allocation5]  }
  0x1b   :  { %v393_v38 = vld [vmem:[%s719_s6] ss:$0 sm:$0xff]  ;;  %s366_s5 = sshll.u32 %s553_s4, 4  ;;  %s367_s5 = int_to_ptr.vmem [resolvable:$true] %s366_s5 }
  0x1c   :  { %s524_s6 = scalar_lea.vmem %s367_s5, 128  ;;  %p529_p9 = scmp.lt.s32.totalorder %s367_s5, %s367_s5 }
  0x1d   :  { %427 = vmatpush3.bf16.msra.mxu0 %v480_v3  ;;  %447 = vmatpush3.bf16.msra.mxu1 %v488_v8  ;;  %p525_p8 = scmp.ne.s32.totalorder %s367_s5, %s524_s6  ;;  %p530_p10 = scmp.lt.s32.totalorder %s524_s6, %s524_s6 }
  0x1e   :  { %428 = vmatprep.subr.bf16.mxu0 %v551_v0  ;;  %448 = vmatprep.subr.bf16.mxu1 %v551_v0 }
  0x1f   :  { %p531_p11 = por %p530_p10, %p529_p9 }
  0x21   :  { %429 = vmatpush3.bf16.msra.mxu0 %v481_v5  ;;  %449 = vmatpush3.bf16.msra.mxu1 %v489_v10  ;;  %p532_p12 = pnand %p531_p11, %p525_p8 }
  0x22   :  { %430 = vmatprep.subr.bf16.mxu0 %v551_v0  ;;  %450 = vmatprep.subr.bf16.mxu1 %v551_v0 }
  0x25   :  { %431 = vmatpush3.bf16.msra.mxu0 %v482_v7  ;;  %451 = vmatpush3.bf16.msra.mxu1 %v490_v12 }
  0x26   :  { %432 = vmatprep.subr.bf16.mxu0 %v551_v0  ;;  %452 = vmatprep.subr.bf16.mxu1 %v551_v0 }
  0x29   :  { %433 = vmatpush3.bf16.msra.mxu0 %v483_v9  ;;  %453 = vmatpush3.bf16.msra.mxu1 %v491_v14 }
  0x2a   :  { %434 = vmatprep.subr.bf16.mxu0 %v551_v0  ;;  %454 = vmatprep.subr.bf16.mxu1 %v551_v0 }
  0x2d   :  { %435 = vmatpush3.bf16.msra.mxu0 %v484_v11  ;;  %455 = vmatpush3.bf16.msra.mxu1 %v492_v16 }
  0x2e   :  { %436 = vmatprep.subr.bf16.mxu0 %v551_v0  ;;  %456 = vmatprep.subr.bf16.mxu1 %v551_v0 }
  0x31   :  { %437 = vmatpush3.bf16.msra.mxu0 %v485_v13  ;;  %457 = vmatpush3.bf16.msra.mxu1 %v493_v17 }
  0x32   :  { %462 = vmatprep.subr.bf16.mxu0 %v551_v0 }
  0x34   :  { %439 = vmatmul.mubr.bf16.vlgmr.msra.gmra.mrb[0].mxu0 %v40_v15 }
  0x35   :  { %470 = vmatprep.mubr.msk.bf16.mxu0 %vm552_vm0, %v551_v0  ;;  %463 = vmatpush3.bf16.msra.mxu0 %v494_v18 }
  0x36   :  { %464 = vmatprep.subr.bf16.mxu0 %v551_v0 }
  0x39   :  { %465 = vmatpush3.bf16.msra.mxu0 %v495_v19 }
  0x3a   :  { %466 = vmatprep.subr.bf16.mxu0 %v551_v0 }
  0x3d   :  { %467 = vmatpush3.bf16.msra.mxu0 %v496_v28 }
  0x3e   :  { %468 = vmatprep.subr.bf16.mxu0 %v551_v0 }
  0x41   :  { %469 = vmatpush3.bf16.msra.mxu0 %v497_v29 }
 0x107   :  { %v146_v21 = vpop.f32.mrb[0].mxu0 }
 0x108   :  { %v147_v22 = vadd.f32 %v375_v20, %v146_v21  ;;  %v440_v23 = vpop.f32.mrb[1].mxu0 }
 0x109   :  { %v149_v24 = vpop.f32.mrb[2].mxu0 }
 0x10a   :  { %v152_v25 = vmax.f32 %v147_v22, 0.0  ;;  %v441_v26 = vpop.f32.mrb[3].mxu0 }
 0x10c   :  { %v153_v27 = vpack.c.bf16 %v152_v25, %v152_v25 }
 0x10e   :  { %459 = vmatmul.mubr.bf16.vlgmr.msra.gmra.mrb[0].mxu1 %v153_v27 }
 0x1e1   :  { %v259_v31 = vpop.f32.mrb[0].mxu1 }
 0x1e2   :  { %v260_v32 = vadd.f32 %v384_v30, %v259_v31  ;;  %v460_v33 = vpop.f32.mrb[1].mxu1 }
 0x1e3   :  { %v262_v34 = vpop.f32.mrb[2].mxu1 }
 0x1e4   :  { %v265_v35 = vmax.f32 %v260_v32, 0.0  ;;  %v461_v36 = vpop.f32.mrb[3].mxu1 }
 0x1e6   :  { %v266_v37 = vpack.c.bf16 %v265_v35, %v265_v35 }
 0x1e8   :  { %471 = vmatmul.mubr.msk.bf16.vlgmr.msra.gmra.mrb[4].mxu0 %vm306_vm1, %v266_v37 }
 0x2bb   :  { %v344_v39 = vpop.f32.mrb[4].mxu0 }
 0x2bc   :  { %v345_v40 = vadd.f32 %v393_v38, %v344_v39  ;;  %v472_v41 = vpop.f32.mrb[5].mxu0 }
 0x2bd   :  { %v347_v42 = vpop.f32.mrb[6].mxu0 }
 0x2be   :  { %350 = vmax.xlane.f32.xlu0 %v345_v40  ;;  %v473_v43 = vpop.f32.mrb[7].mxu0 }
 0x34b   :  { %v351_v44 = vpop.xlane.xlu0 %350 }
 0x34c   :  { %v352_v45 = vsub.f32 %v345_v40, %v351_v44 }
 0x34e   :  { %v353_v46 = vmul.f32 1.442695, %v352_v45 }
 0x350   :  { %498 = vpow2.f32 %v353_v46 }
 0x35a   :  { %v499_v47 = vpop.eup %498 }
 0x35b   :  { %355 = vadd.xlane.f32.xlu0 %v499_v47 }
 0x3e8   :  { %v356_v48 = vpop.xlane.xlu0 %355 }
 0x3e9   :  { %500 = vrcp.f32 %v356_v48 }
 0x3f3   :  { %v501_v49 = vpop.eup %500 }
 0x3f4   :  { %v358_v50 = vmul.f32 %v501_v49, %v499_v47 }
 0x3f6   :  { %359 = vst [vmem:[#allocation5] sm:$0xff] %v358_v50 }
 0x3f7   :  { %535 = shalt.err (!%p532_p12)
}
 0x3f8   :  { %s536_s10 = scalar_lea.hbm %s720_s7, 128 }
 0x3f9   :  { %p537_p13 = scmp.ne.s32.totalorder %s720_s7, %s536_s10  ;;  %p540_p0 = scmp.lt.u32.totalorder %s536_s10, %s720_s7 }
 0x3fb   :  { %p542_p1 = pnand %p540_p0, %p537_p13 }
 0x3fd   :  { %545 = shalt.err (!%p542_p1)
}
 0x3fe   :  { %369 = dma.vmem_to_hbm [thread:$0]  %s367_s5, 128, %s720_s7, [#allocation4]  }
 0x3ff   :  { %548 = dma.done.wait [#allocation4], 128  }
 0x400   :  { %549 = vsyncadd [#allocation4], 4294967168 }
 0x401   :  { %373 = vsyncpa [#allocation3], 1 }
 0x402   :  { %374 = vsyncpa [#allocation4], 1 }

</bundles_post_ra>
